<compile_context>
chip_gen: v7x
topology: tpu7x:2x2x1
jax: 0.10.0
libtpu: 0.0.40
codegen_flags: <defaults>
</compile_context>

<pallas_src>
from functools import partial

import numpy as np
import jax
import jax.numpy as jnp
from jax.experimental import pallas as pl
from jax.experimental.pallas import tpu as pltpu


# -----------------------------------------------------------------------------
# Kernel 1: per-call-constant precompute (run once per forward() call).
#   e  = ReLU(patches @ enc_w + enc_b)          # 3x3 encoder via im2col
#   gx = e @ [wzx|wrx|whx] + [bz|br|bh]         # fused x-path gate slab (M, 3*Rh)
# -----------------------------------------------------------------------------
def _precompute_kernel(patches_ref, enc_w_ref, enc_b_ref, wx_ref, bx_ref, gx_ref):
    f32 = jnp.float32
    e = jnp.dot(patches_ref[...], enc_w_ref[...], preferred_element_type=f32)
    e = jnp.maximum(e + enc_b_ref[...], 0.0)
    gx_ref[...] = jnp.dot(e, wx_ref[...], preferred_element_type=f32) + bx_ref[...]


@partial(jax.jit, static_argnames=("tm",))
def precompute_gx(patches, enc_w, enc_b, wx_all, bx_all, *, tm):
    M, kp = patches.shape
    n3rh = wx_all.shape[1]

    def full(a):
        return pl.BlockSpec(a.shape, lambda i: (0,) * a.ndim)

    return pl.pallas_call(
        _precompute_kernel,
        grid=(M // tm,),
        in_specs=[pl.BlockSpec((tm, kp), lambda i: (i, 0)),
                  full(enc_w), full(enc_b), full(wx_all), full(bx_all)],
        out_specs=pl.BlockSpec((tm, n3rh), lambda i: (i, 0)),
        out_shape=jax.ShapeDtypeStruct((M, n3rh), jnp.float32),
        compiler_params=pltpu.CompilerParams(
            dimension_semantics=("parallel",)),
    )(patches, enc_w, enc_b, wx_all, bx_all)


# -----------------------------------------------------------------------------
# Kernel 2: fused time-loop ConvGRU + decoder.
# grid = (M//tm, t_chunk); t (time) is the innermost, sequential axis.
# gx / h_in / weights / all outputs have block indices constant along t, so
# they are DMA'd (in or out) once per row tile and stay resident in VMEM.
# -----------------------------------------------------------------------------
def _gru_chunk_kernel(gx_ref, h_in_ref, wzrh_ref, whh_ref, dec_w_ref, dec_b_ref,
                      frames_ref, h_out_ref, nz_ref, *, ci):
    f32 = jnp.float32
    t = pl.program_id(1)
    n_t = pl.num_programs(1)
    rh = h_in_ref.shape[1]

    # Hidden state is carried directly in the VMEM-resident output block: one
    # load + one store of (tm, Rh) per step, one HBM writeback per row tile.
    @pl.when(t == 0)
    def _():
        h_out_ref[...] = h_in_ref[...]

    h = h_out_ref[...]

    # Fused z|r hidden-path matmul; one sigmoid over the fused 2*Rh width.
    hzr = jnp.dot(h, wzrh_ref[...], preferred_element_type=f32)
    zr = jax.nn.sigmoid(gx_ref[:, : 2 * rh] + hzr)
    z = zr[:, :rh]
    r = zr[:, rh:]
    h_cand = jnp.tanh(
        gx_ref[:, 2 * rh:]
        + jnp.dot(r * h, whh_ref[...], preferred_element_type=f32))
    h_new = (1.0 - z) * h + z * h_cand
    h_out_ref[...] = h_new
    # TODO(synk): GRU convention ((1-z)*h + z*h_cand) and z/r ordering assumed;
    # verify against ImagesRNNCell (source not provided).

    # Decoder pre-activation at full slab width (the (Rh, t_chunk*Ci) matmul
    # costs the same MXU pass as (Rh, Ci)), placed into the lane-dense,
    # VMEM-resident frames slab with a static-iota select: no per-step
    # lane-sparse HBM DMA, no dynamic-lane-offset store.
    pre = jnp.dot(h_new, dec_w_ref[...], preferred_element_type=f32) + dec_b_ref[...]
    lane = jax.lax.broadcasted_iota(jnp.int32, pre.shape, 1)
    lo = t * ci
    mask = (lane >= lo) & (lane < lo + ci)
    frames_ref[...] = jnp.where(mask, pre, frames_ref[...])

    # Last step of this row tile: one sigmoid over the whole slab (amortized
    # over t_chunk steps) + per-lane nonzero flags for the host-side
    # early-stop check (no extra HBM pass over the frames in the wrapper).
    @pl.when(t == n_t - 1)
    def _():
        frame_slab = jax.nn.sigmoid(frames_ref[...])
        frames_ref[...] = frame_slab
        nz_ref[0] = jnp.max((frame_slab != 0.0).astype(f32), axis=0, keepdims=True)


@partial(jax.jit, static_argnames=("t_chunk", "tm", "ci"))
def decode_chunk(gx, h_flat, wzrh, whh, dec_w_wide, dec_b_wide, *, t_chunk, tm, ci):
    """One pallas_call producing a lane-dense frames slab (M, t_chunk*Ci), the
    carried hidden state (M, Rh) and the per-frame all-zero flags (t_chunk,)."""
    M, rh = h_flat.shape
    lane_w = t_chunk * ci
    n_tiles = M // tm

    def const(a):
        return pl.BlockSpec(a.shape, lambda i, t: (0,) * a.ndim)

    frames_slab, h_new, nz = pl.pallas_call(
        partial(_gru_chunk_kernel, ci=ci),
        grid=(n_tiles, t_chunk),
        in_specs=[pl.BlockSpec((tm, 3 * rh), lambda i, t: (i, 0)),   # gx slab
                  pl.BlockSpec((tm, rh), lambda i, t: (i, 0)),       # h in
                  const(wzrh), const(whh), const(dec_w_wide), const(dec_b_wide)],
        out_specs=(pl.BlockSpec((tm, lane_w), lambda i, t: (i, 0)),        # frames
                   pl.BlockSpec((tm, rh), lambda i, t: (i, 0)),            # h carry
                   pl.BlockSpec((1, 1, lane_w), lambda i, t: (i, 0, 0))),  # nz flags
        out_shape=(jax.ShapeDtypeStruct((M, lane_w), jnp.float32),
                   jax.ShapeDtypeStruct((M, rh), jnp.float32),
                   jax.ShapeDtypeStruct((n_tiles, 1, lane_w), jnp.float32)),
        input_output_aliases={1: 1},                       # donate hidden-state buffer
        compiler_params=pltpu.CompilerParams(
            dimension_semantics=("parallel", "arbitrary"),
            vmem_limit_bytes=32 * 1024 * 1024),
    )(gx, h_flat, wzrh, whh, dec_w_wide, dec_b_wide)

    # Tiny reduce over row tiles -> per-frame all-zero flags (device side).
    nz_any = jnp.max(nz, axis=(0, 1))                          # (t_chunk*Ci,)
    allzero = jnp.max(nz_any.reshape(t_chunk, ci), axis=1) == 0.0
    return frames_slab, h_new, allzero


# -----------------------------------------------------------------------------
# JAX glue: im2col, parameter init, tile picking, full-path decode loop.
# -----------------------------------------------------------------------------
def _im2col3x3(x_nchw):
    """(B, C, H, W) NCHW -> (B*H*W, 9*C) patches, zero padding=1.
    Patch order is (di, dj) major, channel minor; enc_w must match."""
    B, C, H, W = x_nchw.shape
    x = jnp.transpose(x_nchw, (0, 2, 3, 1))                     # NHWC
    xp = jnp.pad(x, ((0, 0), (1, 1), (1, 1), (0, 0)))
    patches = jnp.concatenate(
        [xp[:, di:di + H, dj:dj + W, :] for di in range(3) for dj in range(3)],
        axis=-1)                                                # (B,H,W,9*C)
    return patches.reshape(B * H * W, 9 * C)


def _pick_tm(M, rh, lane_w, vmem_budget=24 << 20, cap=4096):
    """Largest row tile dividing M (multiple of 8) that fits the VMEM budget,
    preferring >=2 row tiles so the 'parallel' grid axis can shard over v7x's
    two TensorCores (on 1-TC v5e/v6e the extra grid step costs ~0.35us)."""
    assert M % 8 == 0, "B*H*W must be a multiple of 8"
    # rough per-row f32 footprint, double-buffered: gx + h_in + h_out + frames
    per_row = 4 * (2 * 3 * rh + 2 * rh + 2 * rh + 2 * lane_w)
    cap = min(cap, M, max(8, (vmem_budget // per_row) // 8 * 8))
    divisors = [t for t in range(8, cap + 1, 8) if M % t == 0]
    if not divisors:
        return M
    multi = [t for t in divisors if M // t >= 2]
    return multi[-1] if multi else divisors[-1]


def init_params(key, image_channels, hidden_channels, rnn_hidden_layer_size):
    ci, ch, rh = image_channels, hidden_channels, rnn_hidden_layer_size
    ks = jax.random.split(key, 8)

    def w(k, shape, scale=0.1):
        return jax.random.normal(k, shape, jnp.float32) * scale

    return dict(
        enc_w=w(ks[0], (9 * ci, ch)),
        enc_b=jnp.zeros((1, ch), jnp.float32),
        wzx=w(ks[1], (ch, rh)), wzh=w(ks[2], (rh, rh)),
        bz=jnp.zeros((1, rh), jnp.float32),
        wrx=w(ks[3], (ch, rh)), wrh=w(ks[4], (rh, rh)),
        br=jnp.zeros((1, rh), jnp.float32),
        whx=w(ks[5], (ch, rh)), whh=w(ks[6], (rh, rh)),
        bh=jnp.zeros((1, rh), jnp.float32),
        dec_w=w(ks[7], (rh, ci)),
        dec_b=jnp.zeros((1, ci), jnp.float32),
    )


def images_decoder_full_path(reference_image, h0, params, animation_limit,
                             chunk_size=32):
    """Mirrors ImagesDecoderFullPath.forward.

    reference_image: (B, Ci, H, W) NCHW, h0: (B, Rh, H, W) NCHW.
    Returns stacked frames (T, B, Ci, H, W), T <= max(animation_limit, 1),
    stopping early (inclusive) at the first all-zero frame.
    """
    B, Ci, H, W = reference_image.shape
    Rh = h0.shape[1]
    M = B * H * W

    # Frames-per-kernel-call: big enough that the frames slab is lane dense
    # (t_chunk*Ci >= 128) and per-chunk fixed costs (dispatch, host sync,
    # gx/weight re-DMA) amortize; extra frames past animation_limit are
    # discarded on the host.
    t_chunk = max(1, min(chunk_size, max(animation_limit, 1)))
    t_min = -(-128 // Ci)
    t_chunk = min(max(t_chunk, t_min), max(chunk_size, 1))
    lane_w = t_chunk * Ci

    tm = _pick_tm(M, Rh, lane_w)

    # Hoisted, reference-image-only compute (one Pallas call per forward()).
    patches = _im2col3x3(reference_image)
    wx_all = jnp.concatenate([params["wzx"], params["wrx"], params["whx"]], axis=1)
    bx_all = jnp.concatenate([params["bz"], params["br"], params["bh"]], axis=1)
    gx = precompute_gx(patches, params["enc_w"], params["enc_b"], wx_all, bx_all,
                       tm=tm)

    h_flat = jnp.transpose(h0, (0, 2, 3, 1)).reshape(M, Rh)
    wzrh = jnp.concatenate([params["wzh"], params["wrh"]], axis=1)   # (Rh, 2*Rh)
    dec_w_wide = jnp.tile(params["dec_w"], (1, t_chunk))             # (Rh, t_chunk*Ci)
    dec_b_wide = jnp.tile(params["dec_b"], (1, t_chunk))             # (1, t_chunk*Ci)

    kept = []          # (frames slab, frames-to-keep) per chunk
    produced = 0
    while True:
        frames_slab, h_flat, allzero = decode_chunk(
            gx, h_flat, wzrh, params["whh"], dec_w_wide, dec_b_wide,
            t_chunk=t_chunk, tm=tm, ci=Ci)

        # One device->host sync per chunk (vs. per frame in the torch loop).
        # TODO(synk): exact-zero post-sigmoid test mirrors torch
        # count_nonzero(frame).item() == 0; it only fires via f32 underflow.
        allzero = np.asarray(jax.device_get(allzero))

        take = min(t_chunk, max(1, animation_limit - produced))
        stop = (produced + take) >= animation_limit
        zero_idx = np.flatnonzero(allzero[:take])
        if zero_idx.size:                  # first all-zero frame: keep it, stop
            take = int(zero_idx[0]) + 1
            stop = True
        kept.append((frames_slab, take))
        produced += take
        if stop:
            break

    # Convert only the kept frames, once, after the generation loop:
    # slab (M, t_chunk*Ci) -> (take, B, Ci, H, W) NCHW.
    def to_nchw(slab, take):
        x = slab.reshape(B, H, W, t_chunk, Ci)[:, :, :, :take, :]
        return jnp.transpose(x, (3, 0, 4, 1, 2))

    chunks = [to_nchw(s, k) for s, k in kept]
    return chunks[0] if len(chunks) == 1 else jnp.concatenate(chunks, axis=0)


# -----------------------------------------------------------------------------
if __name__ == "__main__":
    B, Ci, H, W = 2, 4, 16, 16          # small NCHW reference image
    Ch = 8                              # hidden_channels
    Rh = 32                             # rnn_hidden_layer_size
    animation_limit = 8

    key = jax.random.PRNGKey(0)
    k_img, k_h, k_p = jax.random.split(key, 3)

    reference_image = jax.random.normal(k_img, (B, Ci, H, W), jnp.float32)
    h0 = jax.random.normal(k_h, (B, Rh, H, W), jnp.float32) * 0.1
    params = init_params(k_p, Ci, Ch, Rh)

    out = images_decoder_full_path(reference_image, h0, params, animation_limit)
    out = jax.block_until_ready(out)
    assert out.shape == (animation_limit, B, Ci, H, W), out.shape
    assert bool(jnp.isfinite(out).all())
    print("KERNEL_OK")
</pallas_src>

<mosaic_0001>
module attributes {stable_mosaic.version = 11 : i64} {
  func.func @_precompute_kernel(%arg0: i32, %arg1: memref<256x36xf32, #tpu.memory_space<vmem>>, %arg2: memref<36x8xf32, #tpu.memory_space<vmem>>, %arg3: memref<1x8xf32, #tpu.memory_space<vmem>>, %arg4: memref<8x96xf32, #tpu.memory_space<vmem>>, %arg5: memref<1x96xf32, #tpu.memory_space<vmem>>, %arg6: memref<256x96xf32, #tpu.memory_space<vmem>>) attributes {dimension_semantics = [#tpu.dimension_semantics<parallel>], iteration_bounds = array<i64: 2>, scalar_prefetch = 0 : i64, scratch_operands = 0 : i64, tpu.core_type = #tpu.core_type<tc>, window_params = [{transform_indices = @transform_0, window_bounds = array<i64: 256, 36>}, {pipeline_mode = #tpu.pipeline_mode<synchronous>, transform_indices = @transform_1, window_bounds = array<i64: 36, 8>}, {pipeline_mode = #tpu.pipeline_mode<synchronous>, transform_indices = @transform_2, window_bounds = array<i64: 1, 8>}, {pipeline_mode = #tpu.pipeline_mode<synchronous>, transform_indices = @transform_3, window_bounds = array<i64: 8, 96>}, {pipeline_mode = #tpu.pipeline_mode<synchronous>, transform_indices = @transform_4, window_bounds = array<i64: 1, 96>}, {transform_indices = @transform_5, window_bounds = array<i64: 256, 96>}]} {
    %c0 = arith.constant 0 : index
    %c0_0 = arith.constant 0 : index
    %0 = vector.load %arg1[%c0, %c0_0] : memref<256x36xf32, #tpu.memory_space<vmem>>, vector<256x36xf32>
    %c0_1 = arith.constant 0 : index
    %c0_2 = arith.constant 0 : index
    %1 = vector.load %arg2[%c0_1, %c0_2] : memref<36x8xf32, #tpu.memory_space<vmem>>, vector<36x8xf32>
    %cst = arith.constant dense<0.000000e+00> : vector<256x8xf32>
    %2 = tpu.matmul %0, %1, %cst {dimension_numbers = #tpu.dot_dimension_numbers<[1], [0], [0], [1], [0, 0, 1, 1], [], []>} : vector<256x36xf32>, vector<36x8xf32>, vector<256x8xf32> -> vector<256x8xf32>
    %c0_3 = arith.constant 0 : index
    %c0_4 = arith.constant 0 : index
    %3 = vector.load %arg3[%c0_3, %c0_4] : memref<1x8xf32, #tpu.memory_space<vmem>>, vector<1x8xf32>
    %4 = vector.broadcast %3 : vector<1x8xf32> to vector<256x8xf32>
    %5 = arith.addf %2, %4 : vector<256x8xf32>
    %cst_5 = arith.constant 0.000000e+00 : f32
    %6 = vector.broadcast %cst_5 : f32 to vector<256x8xf32>
    %7 = arith.maximumf %5, %6 : vector<256x8xf32>
    %c0_6 = arith.constant 0 : index
    %c0_7 = arith.constant 0 : index
    %8 = vector.load %arg4[%c0_6, %c0_7] : memref<8x96xf32, #tpu.memory_space<vmem>>, vector<8x96xf32>
    %cst_8 = arith.constant dense<0.000000e+00> : vector<256x96xf32>
    %9 = tpu.matmul %7, %8, %cst_8 {dimension_numbers = #tpu.dot_dimension_numbers<[1], [0], [0], [1], [0, 0, 1, 1], [], []>} : vector<256x8xf32>, vector<8x96xf32>, vector<256x96xf32> -> vector<256x96xf32>
    %c0_9 = arith.constant 0 : index
    %c0_10 = arith.constant 0 : index
    %10 = vector.load %arg5[%c0_9, %c0_10] : memref<1x96xf32, #tpu.memory_space<vmem>>, vector<1x96xf32>
    %11 = vector.broadcast %10 : vector<1x96xf32> to vector<256x96xf32>
    %12 = arith.addf %9, %11 : vector<256x96xf32>
    %c0_11 = arith.constant 0 : index
    %c0_12 = arith.constant 0 : index
    %13 = vector.load %arg6[%c0_11, %c0_12] : memref<256x96xf32, #tpu.memory_space<vmem>>, vector<256x96xf32>
    tpu.vector_store %arg6[%c0_11, %c0_12], %12 {strides = array<i32>} : memref<256x96xf32, #tpu.memory_space<vmem>>, vector<256x96xf32>,
    return
  }
  func.func @transform_0(%arg0: i32) -> (i32, i32) {
    %c0_i32 = arith.constant 0 : i32
    %c0_i32_0 = arith.constant 0 : i32
    return %arg0, %c0_i32 : i32, i32
  }
  func.func @transform_1(%arg0: i32) -> (i32, i32) {
    %c0_i32 = arith.constant 0 : i32
    %c0_i32_0 = arith.constant 0 : i32
    %c0_i32_1 = arith.constant 0 : i32
    return %c0_i32, %c0_i32_0 : i32, i32
  }
  func.func @transform_2(%arg0: i32) -> (i32, i32) {
    %c0_i32 = arith.constant 0 : i32
    %c0_i32_0 = arith.constant 0 : i32
    %c0_i32_1 = arith.constant 0 : i32
    return %c0_i32, %c0_i32_0 : i32, i32
  }
  func.func @transform_3(%arg0: i32) -> (i32, i32) {
    %c0_i32 = arith.constant 0 : i32
    %c0_i32_0 = arith.constant 0 : i32
    %c0_i32_1 = arith.constant 0 : i32
    return %c0_i32, %c0_i32_0 : i32, i32
  }
  func.func @transform_4(%arg0: i32) -> (i32, i32) {
    %c0_i32 = arith.constant 0 : i32
    %c0_i32_0 = arith.constant 0 : i32
    %c0_i32_1 = arith.constant 0 : i32
    return %c0_i32, %c0_i32_0 : i32, i32
  }
  func.func @transform_5(%arg0: i32) -> (i32, i32) {
    %c0_i32 = arith.constant 0 : i32
    %c0_i32_0 = arith.constant 0 : i32
    return %arg0, %c0_i32 : i32, i32
  }
}

</mosaic_0001>

<bundles_post_ra>
// kernel: precompute_gx.1
= control target key start
LH: loop header
LB: loop body
LE: loop exit
PB: predicated region body
PF: predicated region fallthrough
CT: control target
= control target key end

     0   :  { %s1359_s18 = smov 0   ;;  %s1639_s0 = inlined_call_operand.vmem [shape: f32[512,36], index: 0, kind: input, shape index: {}]   ;;  %s1640_s1 = inlined_call_operand.vmem [shape: f32[36,8], index: 1, kind: input, shape index: {}]   ;;  %s1641_s2 = inlined_call_operand.vmem [shape: f32[1,8], index: 2, kind: input, shape index: {}]   ;;  %s1642_s3 = inlined_call_operand.vmem [shape: f32[8,96], index: 3, kind: input, shape index: {}]   ;;  %s1643_s4 = inlined_call_operand.vmem [shape: f32[1,96], index: 4, kind: input, shape index: {}]   ;;  %s1644_s5 = inlined_call_operand.vmem [shape: f32[512,96], index: 5, kind: output, shape index: {}]  }
   0x1 LB: > { %s1049_s19 = sadd.s32 4294967295, %s1327_s18   ;;  %p1053_p0 = scmp.ge.s32.totalorder %s1327_s18, 1  ;;  %s1327_s18 = sphi %s1359_s18, %s15_s18  }
   0x2   : > { %p188_p1 = scmp.lt.s32.totalorder %s1327_s18, 3 }
   0x4   : > { %p189_p2 = pnand %p1053_p0, %p188_p1 }
   0x5   : > { %v260_v0 = vld [vmem:[%s1640_s1] sm:$0xff] (!%p189_p2)  ;;  %v261_v1 = vld [vmem:[%s1640_s1 + $0x8] sm:$0xff] (!%p189_p2)  ;;  %v262_v2 = vld [vmem:[%s1640_s1 + $0x10] sm:$0xff] (!%p189_p2)  ;;  %s1054_s26 = sshll.u32 (!%p189_p2), %s1049_s19, 5  ;;  %vm272_vm0 = vcmask (!%p189_p2), 293888   ;;  %vm369_vm1 = vcmask (!%p189_p2), 1043456  }
   0x6   : > { %192 = sbr.rel (%p189_p2) target bundleno = 512 (0x200), region = 40  ;;  %v1305_v3 = vpack.c.bf16 (!%p189_p2), %v261_v1, %v260_v0  ;;  %v263_v4 = vld [vmem:[%s1640_s1 + $0x18] sm:$0xff] (!%p189_p2)  ;;  %p217_p3 = scmp.lt.s32.totalorder (!%p189_p2), %s1054_s26, 63  ;;  %v264_v6 = vld [vmem:[%s1640_s1 + $0x20] sm:$0xf] (!%p189_p2)  ;;  %vm638_vm2 = vcmask (!%p189_p2), 64512  }
   0x7   : > { %v1309_v5 = vpack.c.bf16 (!%p189_p2), %v263_v4, %v262_v2  ;;  %v630_v39 = vld [vmem:[%s1642_s3] sm:$0xff] (!%p189_p2)  ;;  %vm960_vm3 = vcmask (!%p189_p2), 785408  }
   0x8   : > { %1306 = vmatprep.subr.bf16.mxu0 (!%p189_p2), %v1305_v3  ;;  %1255 = vmatprep.subr.mxu1 (!%p189_p2), %v630_v39  ;;  %v1462_v40 = vld [vmem:[%s1641_s2] ss:$0 sm:$0xff] (!%p189_p2) }
   0x9   : > { %1308 = vmatpush3.bf16.msra.mxu0 (!%p189_p2), %v1305_v3  ;;  %1256 = vmatpush3.msra.mxu1 (!%p189_p2), %v630_v39 }
   0xa   : > { %1310 = vmatprep.subr.bf16.mxu0 (!%p189_p2), %v1309_v5 }
   0xd   : > { %s1646_s26 = smov (!%p217_p3, %s1054_s26), 63  ;;  %1312 = vmatpush3.bf16.msra.mxu0 %v1309_v5 }
   0xe   : > { %s1055_s29 = sshll.u32 %s1646_s26, 3  ;;  %1205 = vmatprep.subr.msk.mxu0 %vm369_vm1, %v264_v6 }
   0xf   : > { %s1390_s9 = scalar_lea.vmem %s1639_s0, %s1055_s29  ;;  %s1538_s19 = scalar_lea.vmem %s1644_s5, %s1055_s29 }
  0x10   : > { %v228_v7 = vld [vmem:[%s1390_s9] sm:$0xff]  ;;  %v229_v8 = vld [vmem:[%s1390_s9 + $0x8] sm:$0xff]  ;;  %v230_v9 = vld [vmem:[%s1390_s9 + $0x10] sm:$0xff] }
  0x11   : > { %1207 = vmatprep.mubr.msk.f32.mxu0 %vm272_vm0, %v228_v7  ;;  %1206 = vmatpush3.msk.msra.mxu0 %vm369_vm1, %v264_v6  ;;  %v231_v10 = vld [vmem:[%s1390_s9 + $0x18] sm:$0xff]  ;;  %v232_v11 = vld [vmem:[%s1390_s9 + $0x20] sm:$0xff]  ;;  %v233_v12 = vld [vmem:[%s1390_s9 + $0x28] sm:$0xff] }
  0x12   : > { %1208 = vmatmul.mubr.msk.f32.vlgmr.msra.gmra.mrb[0].mxu0 %vm272_vm0, %v229_v8  ;;  %v234_v13 = vld [vmem:[%s1390_s9 + $0x30] sm:$0xff]  ;;  %v235_v14 = vld [vmem:[%s1390_s9 + $0x38] sm:$0xff]  ;;  %v236_v15 = vld [vmem:[%s1390_s9 + $0x40] sm:$0xff] }
  0x13   : > { %1210 = vmatprep.mubr.msk.f32.mxu0 %vm272_vm0, %v230_v9  ;;  %v237_v16 = vld [vmem:[%s1390_s9 + $0x48] sm:$0xff]  ;;  %v238_v17 = vld [vmem:[%s1390_s9 + $0x50] sm:$0xff]  ;;  %v239_v18 = vld [vmem:[%s1390_s9 + $0x58] sm:$0xff] }
  0x14   : > { %v240_v19 = vld [vmem:[%s1390_s9 + $0x60] sm:$0xff]  ;;  %v241_v20 = vld [vmem:[%s1390_s9 + $0x68] sm:$0xff]  ;;  %v242_v21 = vld [vmem:[%s1390_s9 + $0x70] sm:$0xff] }
  0x15   : > { %v243_v22 = vld [vmem:[%s1390_s9 + $0x78] sm:$0xff]  ;;  %v244_v23 = vld [vmem:[%s1390_s9 + $0x80] sm:$0xff]  ;;  %v245_v24 = vld [vmem:[%s1390_s9 + $0x88] sm:$0xff] }
  0x16   : > { %1211 = vmatmul.mubr.msk.f32.gmra.mrb[2].mxu0 %vm272_vm0, %v231_v10  ;;  %v246_v25 = vld [vmem:[%s1390_s9 + $0x90] sm:$0xff]  ;;  %v247_v26 = vld [vmem:[%s1390_s9 + $0x98] sm:$0xff]  ;;  %v248_v27 = vld [vmem:[%s1390_s9 + $0xa0] sm:$0xff] }
  0x17   : > { %1213 = vmatprep.mubr.msk.f32.mxu0 %vm272_vm0, %v232_v11  ;;  %v249_v28 = vld [vmem:[%s1390_s9 + $0xa8] sm:$0xff]  ;;  %v250_v29 = vld [vmem:[%s1390_s9 + $0xb0] sm:$0xff]  ;;  %v251_v30 = vld [vmem:[%s1390_s9 + $0xb8] sm:$0xff] }
  0x18   : > { %v252_v31 = vld [vmem:[%s1390_s9 + $0xc0] sm:$0xff]  ;;  %v253_v32 = vld [vmem:[%s1390_s9 + $0xc8] sm:$0xff]  ;;  %v254_v33 = vld [vmem:[%s1390_s9 + $0xd0] sm:$0xff] }
  0x19   : > { %v255_v34 = vld [vmem:[%s1390_s9 + $0xd8] sm:$0xff]  ;;  %v256_v35 = vld [vmem:[%s1390_s9 + $0xe0] sm:$0xff]  ;;  %v257_v36 = vld [vmem:[%s1390_s9 + $0xe8] sm:$0xff] }
  0x1a   : > { %1214 = vmatmul.mubr.msk.f32.gmra.mrb[4].mxu0 %vm272_vm0, %v233_v12  ;;  %v258_v37 = vld [vmem:[%s1390_s9 + $0xf0] sm:$0xff]  ;;  %v259_v38 = vld [vmem:[%s1390_s9 + $0xf8] sm:$0xff] }
  0x1b   : > { %1216 = vmatprep.mubr.msk.f32.mxu0 %vm272_vm0, %v234_v13 }
  0x1e   : > { %1217 = vmatmul.mubr.msk.f32.gmra.mrb[6].mxu0 %vm272_vm0, %v235_v14 }
  0x1f   : > { %1219 = vmatprep.mubr.msk.f32.mxu0 %vm272_vm0, %v236_v15 }
  0x22   : > { %1220 = vmatmul.mubr.msk.f32.gmra.mrb[8].mxu0 %vm272_vm0, %v237_v16 }
  0x23   : > { %1222 = vmatprep.mubr.msk.f32.mxu0 %vm272_vm0, %v238_v17 }
  0x26   : > { %1223 = vmatmul.mubr.msk.f32.gmra.mrb[10].mxu0 %vm272_vm0, %v239_v18 }
  0x27   : > { %1225 = vmatprep.mubr.msk.f32.mxu0 %vm272_vm0, %v240_v19 }
  0x2a   : > { %1226 = vmatmul.mubr.msk.f32.gmra.mrb[12].mxu0 %vm272_vm0, %v241_v20 }
  0x2b   : > { %1228 = vmatprep.mubr.msk.f32.mxu0 %vm272_vm0, %v242_v21 }
  0x2e   : > { %1229 = vmatmul.mubr.msk.f32.gmra.mrb[14].mxu0 %vm272_vm0, %v243_v22 }
  0x2f   : > { %1231 = vmatprep.mubr.msk.f32.mxu0 %vm272_vm0, %v244_v23 }
  0x32   : > { %1232 = vmatmul.mubr.msk.f32.gmra.mrb[16].mxu0 %vm272_vm0, %v245_v24 }
  0x33   : > { %1234 = vmatprep.mubr.msk.f32.mxu0 %vm272_vm0, %v246_v25 }
  0x36   : > { %1235 = vmatmul.mubr.msk.f32.gmra.mrb[18].mxu0 %vm272_vm0, %v247_v26 }
  0x37   : > { %1237 = vmatprep.mubr.msk.f32.mxu0 %vm272_vm0, %v248_v27 }
  0x3a   : > { %1238 = vmatmul.mubr.msk.f32.gmra.mrb[20].mxu0 %vm272_vm0, %v249_v28 }
  0x3b   : > { %1240 = vmatprep.mubr.msk.f32.mxu0 %vm272_vm0, %v250_v29 }
  0x3e   : > { %1241 = vmatmul.mubr.msk.f32.gmra.mrb[22].mxu0 %vm272_vm0, %v251_v30 }
  0x3f   : > { %1243 = vmatprep.mubr.msk.f32.mxu0 %vm272_vm0, %v252_v31 }
  0x42   : > { %1244 = vmatmul.mubr.msk.f32.gmra.mrb[24].mxu0 %vm272_vm0, %v253_v32 }
  0x43   : > { %1246 = vmatprep.mubr.msk.f32.mxu0 %vm272_vm0, %v254_v33 }
  0x46   : > { %1247 = vmatmul.mubr.msk.f32.gmra.mrb[26].mxu0 %vm272_vm0, %v255_v34 }
  0x47   : > { %1249 = vmatprep.mubr.msk.f32.mxu0 %vm272_vm0, %v256_v35 }
  0x4a   : > { %1250 = vmatmul.mubr.msk.f32.gmra.mrb[28].mxu0 %vm272_vm0, %v257_v36 }
  0x4b   : > { %1252 = vmatprep.mubr.msk.f32.mxu0 %vm272_vm0, %v258_v37 }
  0x4e   : > { %1253 = vmatmul.mubr.msk.f32.gmra.mrb[30].mxu0 %vm272_vm0, %v259_v38 }
  0xe5   : > { %v1209_v41 = vpop.f32.mrb[0].mxu0 }
  0xe6   : > { %v445_v42 = vadd.f32 %v1209_v41, %v1462_v40  ;;  %v439_v43 = vpop.f32.mrb[1].mxu0 }
  0xe7   : > { %v440_v44 = vadd.f32 %v1462_v40, %v439_v43 }
  0xe8   : > { %v599_v47 = vmax.f32 %v445_v42, 0.0 }
  0xe9   : > { %v598_v45 = vmax.f32 %v440_v44, 0.0  ;;  %v1212_v46 = vpop.f32.mrb[2].mxu0 }
  0xea   : > { %v455_v48 = vadd.f32 %v1212_v46, %v1462_v40  ;;  %v449_v49 = vpop.f32.mrb[3].mxu0 }
  0xeb   : > { %v450_v50 = vadd.f32 %v1462_v40, %v449_v49  ;;  %1257 = vmatprep.mubr.msk.f32.mxu1 %vm638_vm2, %v598_v45 }
  0xec   : > { %1258 = vmatmul.mubr.msk.f32.vlgmr.msra.gmra.mrb[0].mxu1 %vm638_vm2, %v599_v47  ;;  %v601_v53 = vmax.f32 %v455_v48, 0.0 }
  0xed   : > { %v600_v51 = vmax.f32 %v450_v50, 0.0  ;;  %v1215_v52 = vpop.f32.mrb[4].mxu0 }
  0xee   : > { %v465_v54 = vadd.f32 %v1215_v52, %v1462_v40  ;;  %v459_v55 = vpop.f32.mrb[5].mxu0 }
  0xef   : > { %v460_v56 = vadd.f32 %v1462_v40, %v459_v55  ;;  %1260 = vmatprep.mubr.msk.f32.mxu1 %vm638_vm2, %v600_v51 }
  0xf0   : > { %1261 = vmatmul.mubr.msk.f32.gmra.mrb[2].mxu1 %vm638_vm2, %v601_v53  ;;  %v603_v59 = vmax.f32 %v465_v54, 0.0 }
  0xf1   : > { %v602_v57 = vmax.f32 %v460_v56, 0.0  ;;  %v1218_v58 = vpop.f32.mrb[6].mxu0 }
  0xf2   : > { %v475_v60 = vadd.f32 %v1218_v58, %v1462_v40  ;;  %v469_v61 = vpop.f32.mrb[7].mxu0 }
  0xf3   : > { %v470_v62 = vadd.f32 %v1462_v40, %v469_v61  ;;  %1263 = vmatprep.mubr.msk.f32.mxu1 %vm638_vm2, %v602_v57 }
  0xf4   : > { %1264 = vmatmul.mubr.msk.f32.gmra.mrb[4].mxu1 %vm638_vm2, %v603_v59  ;;  %v605_v1 = vmax.f32 %v475_v60, 0.0 }
  0xf5   : > { %v604_v63 = vmax.f32 %v470_v62, 0.0  ;;  %v1221_v0 = vpop.f32.mrb[8].mxu0 }
  0xf6   : > { %v485_v2 = vadd.f32 %v1221_v0, %v1462_v40  ;;  %v479_v3 = vpop.f32.mrb[9].mxu0 }
  0xf7   : > { %v480_v4 = vadd.f32 %v1462_v40, %v479_v3  ;;  %1266 = vmatprep.mubr.msk.f32.mxu1 %vm638_vm2, %v604_v63 }
  0xf8   : > { %1267 = vmatmul.mubr.msk.f32.gmra.mrb[6].mxu1 %vm638_vm2, %v605_v1  ;;  %v607_v7 = vmax.f32 %v485_v2, 0.0 }
  0xf9   : > { %v606_v5 = vmax.f32 %v480_v4, 0.0  ;;  %v1224_v6 = vpop.f32.mrb[10].mxu0 }
  0xfa   : > { %v495_v8 = vadd.f32 %v1224_v6, %v1462_v40  ;;  %v489_v9 = vpop.f32.mrb[11].mxu0 }
  0xfb   : > { %v490_v10 = vadd.f32 %v1462_v40, %v489_v9  ;;  %1269 = vmatprep.mubr.msk.f32.mxu1 %vm638_vm2, %v606_v5 }
  0xfc   : > { %1270 = vmatmul.mubr.msk.f32.gmra.mrb[8].mxu1 %vm638_vm2, %v607_v7  ;;  %v609_v13 = vmax.f32 %v495_v8, 0.0 }
  0xfd   : > { %v608_v11 = vmax.f32 %v490_v10, 0.0  ;;  %v1227_v12 = vpop.f32.mrb[12].mxu0  ;;  %v1531_v10 = vld [vmem:[%s1643_s4] ss:$0 sm:$0xff] }
  0xfe   : > { %v505_v14 = vadd.f32 %v1227_v12, %v1462_v40  ;;  %v499_v15 = vpop.f32.mrb[13].mxu0 }
  0xff   : > { %v500_v16 = vadd.f32 %v1462_v40, %v499_v15  ;;  %1272 = vmatprep.mubr.msk.f32.mxu1 %vm638_vm2, %v608_v11 }
 0x100   : > { %1273 = vmatmul.mubr.msk.f32.gmra.mrb[10].mxu1 %vm638_vm2, %v609_v13  ;;  %v611_v19 = vmax.f32 %v505_v14, 0.0 }
 0x101   : > { %v610_v17 = vmax.f32 %v500_v16, 0.0  ;;  %v1230_v18 = vpop.f32.mrb[14].mxu0 }
 0x102   : > { %v515_v20 = vadd.f32 %v1230_v18, %v1462_v40  ;;  %v509_v21 = vpop.f32.mrb[15].mxu0 }
 0x103   : > { %v510_v22 = vadd.f32 %v1462_v40, %v509_v21  ;;  %1275 = vmatprep.mubr.msk.f32.mxu1 %vm638_vm2, %v610_v17 }
 0x104   : > { %1276 = vmatmul.mubr.msk.f32.gmra.mrb[12].mxu1 %vm638_vm2, %v611_v19  ;;  %v613_v25 = vmax.f32 %v515_v20, 0.0 }
 0x105   : > { %v612_v23 = vmax.f32 %v510_v22, 0.0  ;;  %v1233_v24 = vpop.f32.mrb[16].mxu0 }
 0x106   : > { %v525_v26 = vadd.f32 %v1233_v24, %v1462_v40  ;;  %v519_v27 = vpop.f32.mrb[17].mxu0 }
 0x107   : > { %v520_v28 = vadd.f32 %v1462_v40, %v519_v27  ;;  %1278 = vmatprep.mubr.msk.f32.mxu1 %vm638_vm2, %v612_v23 }
 0x108   : > { %1279 = vmatmul.mubr.msk.f32.gmra.mrb[14].mxu1 %vm638_vm2, %v613_v25  ;;  %v615_v31 = vmax.f32 %v525_v26, 0.0 }
 0x109   : > { %v614_v29 = vmax.f32 %v520_v28, 0.0  ;;  %v1236_v30 = vpop.f32.mrb[18].mxu0 }
 0x10a   : > { %v535_v32 = vadd.f32 %v1236_v30, %v1462_v40  ;;  %v529_v33 = vpop.f32.mrb[19].mxu0 }
 0x10b   : > { %v530_v34 = vadd.f32 %v1462_v40, %v529_v33  ;;  %1281 = vmatprep.mubr.msk.f32.mxu1 %vm638_vm2, %v614_v29 }
 0x10c   : > { %1282 = vmatmul.mubr.msk.f32.gmra.mrb[16].mxu1 %vm638_vm2, %v615_v31  ;;  %v617_v37 = vmax.f32 %v535_v32, 0.0 }
 0x10d   : > { %v616_v35 = vmax.f32 %v530_v34, 0.0  ;;  %v1239_v36 = vpop.f32.mrb[20].mxu0 }
 0x10e   : > { %v545_v38 = vadd.f32 %v1239_v36, %v1462_v40  ;;  %v539_v39 = vpop.f32.mrb[21].mxu0 }
 0x10f   : > { %v540_v41 = vadd.f32 %v1462_v40, %v539_v39  ;;  %1284 = vmatprep.mubr.msk.f32.mxu1 %vm638_vm2, %v616_v35 }
 0x110   : > { %1285 = vmatmul.mubr.msk.f32.gmra.mrb[18].mxu1 %vm638_vm2, %v617_v37  ;;  %v619_v44 = vmax.f32 %v545_v38, 0.0 }
 0x111   : > { %v618_v42 = vmax.f32 %v540_v41, 0.0  ;;  %v1242_v43 = vpop.f32.mrb[22].mxu0 }
 0x112   : > { %v555_v45 = vadd.f32 %v1242_v43, %v1462_v40  ;;  %v549_v46 = vpop.f32.mrb[23].mxu0 }
 0x113   : > { %v550_v47 = vadd.f32 %v1462_v40, %v549_v46  ;;  %1287 = vmatprep.mubr.msk.f32.mxu1 %vm638_vm2, %v618_v42 }
 0x114   : > { %1288 = vmatmul.mubr.msk.f32.gmra.mrb[20].mxu1 %vm638_vm2, %v619_v44  ;;  %v621_v50 = vmax.f32 %v555_v45, 0.0 }
 0x115   : > { %v620_v48 = vmax.f32 %v550_v47, 0.0  ;;  %v1245_v49 = vpop.f32.mrb[24].mxu0 }
 0x116   : > { %v565_v51 = vadd.f32 %v1245_v49, %v1462_v40  ;;  %v559_v52 = vpop.f32.mrb[25].mxu0 }
 0x117   : > { %v560_v53 = vadd.f32 %v1462_v40, %v559_v52  ;;  %1290 = vmatprep.mubr.msk.f32.mxu1 %vm638_vm2, %v620_v48 }
 0x118   : > { %1291 = vmatmul.mubr.msk.f32.gmra.mrb[22].mxu1 %vm638_vm2, %v621_v50  ;;  %v623_v56 = vmax.f32 %v565_v51, 0.0 }
 0x119   : > { %v622_v54 = vmax.f32 %v560_v53, 0.0  ;;  %v1248_v55 = vpop.f32.mrb[26].mxu0 }
 0x11a   : > { %v575_v57 = vadd.f32 %v1248_v55, %v1462_v40  ;;  %v569_v58 = vpop.f32.mrb[27].mxu0 }
 0x11b   : > { %v570_v59 = vadd.f32 %v1462_v40, %v569_v58  ;;  %1293 = vmatprep.mubr.msk.f32.mxu1 %vm638_vm2, %v622_v54 }
 0x11c   : > { %1294 = vmatmul.mubr.msk.f32.gmra.mrb[24].mxu1 %vm638_vm2, %v623_v56  ;;  %v625_v62 = vmax.f32 %v575_v57, 0.0 }
 0x11d   : > { %v624_v60 = vmax.f32 %v570_v59, 0.0  ;;  %v1251_v61 = vpop.f32.mrb[28].mxu0 }
 0x11e   : > { %v585_v63 = vadd.f32 %v1251_v61, %v1462_v40  ;;  %v579_v0 = vpop.f32.mrb[29].mxu0 }
 0x11f   : > { %v580_v1 = vadd.f32 %v1462_v40, %v579_v0  ;;  %1296 = vmatprep.mubr.msk.f32.mxu1 %vm638_vm2, %v624_v60 }
 0x120   : > { %1297 = vmatmul.mubr.msk.f32.gmra.mrb[26].mxu1 %vm638_vm2, %v625_v62  ;;  %v627_v4 = vmax.f32 %v585_v63, 0.0 }
 0x121   : > { %v626_v2 = vmax.f32 %v580_v1, 0.0  ;;  %v1254_v3 = vpop.f32.mrb[30].mxu0 }
 0x122   : > { %v595_v5 = vadd.f32 %v1254_v3, %v1462_v40  ;;  %v589_v6 = vpop.f32.mrb[31].mxu0 }
 0x123   : > { %v590_v7 = vadd.f32 %v1462_v40, %v589_v6  ;;  %1299 = vmatprep.mubr.msk.f32.mxu1 %vm638_vm2, %v626_v2 }
 0x124   : > { %1300 = vmatmul.mubr.msk.f32.gmra.mrb[28].mxu1 %vm638_vm2, %v627_v4  ;;  %v629_v9 = vmax.f32 %v595_v5, 0.0 }
 0x125   : > { %v628_v8 = vmax.f32 %v590_v7, 0.0 }
 0x127   : > { %1302 = vmatprep.mubr.msk.f32.mxu1 %vm638_vm2, %v628_v8 }
 0x128   : > { %1303 = vmatmul.mubr.msk.f32.gmra.mrb[30].mxu1 %vm638_vm2, %v629_v9 }
 0x1bf   : > { %v1259_v40 = vpop.f32.mrb[0].mxu1 }
 0x1c0   : > { %v807_v11 = vadd.f32 %v1259_v40, %v1531_v10  ;;  %v801_v12 = vpop.f32.mrb[1].mxu1 }
 0x1c1   : > { %v802_v13 = vadd.f32 %v1531_v10, %v801_v12 }
 0x1c2   : > { %962 = vst.msk [vmem:[%s1538_s19 + $0x8] sm:$0xff] %vm960_vm3, %v807_v11 }
 0x1c3   : > { %961 = vst.msk [vmem:[%s1538_s19] sm:$0xff] %vm960_vm3, %v802_v13  ;;  %v1262_v14 = vpop.f32.mrb[2].mxu1 }
 0x1c4   : > { %v817_v15 = vadd.f32 %v1262_v14, %v1531_v10  ;;  %v811_v16 = vpop.f32.mrb[3].mxu1 }
 0x1c5   : > { %v812_v17 = vadd.f32 %v1531_v10, %v811_v16 }
 0x1c6   : > { %964 = vst.msk [vmem:[%s1538_s19 + $0x18] sm:$0xff] %vm960_vm3, %v817_v15 }
 0x1c7   : > { %963 = vst.msk [vmem:[%s1538_s19 + $0x10] sm:$0xff] %vm960_vm3, %v812_v17  ;;  %v1265_v18 = vpop.f32.mrb[4].mxu1 }
 0x1c8   : > { %v827_v19 = vadd.f32 %v1265_v18, %v1531_v10  ;;  %v821_v20 = vpop.f32.mrb[5].mxu1 }
 0x1c9   : > { %v822_v21 = vadd.f32 %v1531_v10, %v821_v20 }
 0x1ca   : > { %966 = vst.msk [vmem:[%s1538_s19 + $0x28] sm:$0xff] %vm960_vm3, %v827_v19 }
 0x1cb   : > { %965 = vst.msk [vmem:[%s1538_s19 + $0x20] sm:$0xff] %vm960_vm3, %v822_v21  ;;  %v1268_v22 = vpop.f32.mrb[6].mxu1 }
 0x1cc   : > { %v837_v23 = vadd.f32 %v1268_v22, %v1531_v10  ;;  %v831_v24 = vpop.f32.mrb[7].mxu1 }
 0x1cd   : > { %v832_v25 = vadd.f32 %v1531_v10, %v831_v24 }
 0x1ce   : > { %968 = vst.msk [vmem:[%s1538_s19 + $0x38] sm:$0xff] %vm960_vm3, %v837_v23 }
 0x1cf   : > { %967 = vst.msk [vmem:[%s1538_s19 + $0x30] sm:$0xff] %vm960_vm3, %v832_v25  ;;  %v1271_v26 = vpop.f32.mrb[8].mxu1 }
 0x1d0   : > { %v847_v27 = vadd.f32 %v1271_v26, %v1531_v10  ;;  %v841_v28 = vpop.f32.mrb[9].mxu1 }
 0x1d1   : > { %v842_v29 = vadd.f32 %v1531_v10, %v841_v28 }
 0x1d2   : > { %970 = vst.msk [vmem:[%s1538_s19 + $0x48] sm:$0xff] %vm960_vm3, %v847_v27 }
 0x1d3   : > { %969 = vst.msk [vmem:[%s1538_s19 + $0x40] sm:$0xff] %vm960_vm3, %v842_v29  ;;  %v1274_v30 = vpop.f32.mrb[10].mxu1 }
 0x1d4   : > { %v857_v31 = vadd.f32 %v1274_v30, %v1531_v10  ;;  %v851_v32 = vpop.f32.mrb[11].mxu1 }
 0x1d5   : > { %v852_v33 = vadd.f32 %v1531_v10, %v851_v32 }
 0x1d6   : > { %972 = vst.msk [vmem:[%s1538_s19 + $0x58] sm:$0xff] %vm960_vm3, %v857_v31 }
 0x1d7   : > { %971 = vst.msk [vmem:[%s1538_s19 + $0x50] sm:$0xff] %vm960_vm3, %v852_v33  ;;  %v1277_v34 = vpop.f32.mrb[12].mxu1 }
 0x1d8   : > { %v867_v35 = vadd.f32 %v1277_v34, %v1531_v10  ;;  %v861_v36 = vpop.f32.mrb[13].mxu1 }
 0x1d9   : > { %v862_v37 = vadd.f32 %v1531_v10, %v861_v36 }
 0x1da   : > { %974 = vst.msk [vmem:[%s1538_s19 + $0x68] sm:$0xff] %vm960_vm3, %v867_v35 }
 0x1db   : > { %973 = vst.msk [vmem:[%s1538_s19 + $0x60] sm:$0xff] %vm960_vm3, %v862_v37  ;;  %v1280_v38 = vpop.f32.mrb[14].mxu1 }
 0x1dc   : > { %v877_v39 = vadd.f32 %v1280_v38, %v1531_v10  ;;  %v871_v41 = vpop.f32.mrb[15].mxu1 }
 0x1dd   : > { %v872_v42 = vadd.f32 %v1531_v10, %v871_v41 }
 0x1de   : > { %976 = vst.msk [vmem:[%s1538_s19 + $0x78] sm:$0xff] %vm960_vm3, %v877_v39 }
 0x1df   : > { %975 = vst.msk [vmem:[%s1538_s19 + $0x70] sm:$0xff] %vm960_vm3, %v872_v42  ;;  %v1283_v43 = vpop.f32.mrb[16].mxu1 }
 0x1e0   : > { %v887_v44 = vadd.f32 %v1283_v43, %v1531_v10  ;;  %v881_v45 = vpop.f32.mrb[17].mxu1 }
 0x1e1   : > { %v882_v46 = vadd.f32 %v1531_v10, %v881_v45 }
 0x1e2   : > { %978 = vst.msk [vmem:[%s1538_s19 + $0x88] sm:$0xff] %vm960_vm3, %v887_v44 }
 0x1e3   : > { %977 = vst.msk [vmem:[%s1538_s19 + $0x80] sm:$0xff] %vm960_vm3, %v882_v46  ;;  %v1286_v47 = vpop.f32.mrb[18].mxu1 }
 0x1e4   : > { %v897_v48 = vadd.f32 %v1286_v47, %v1531_v10  ;;  %v891_v49 = vpop.f32.mrb[19].mxu1 }
 0x1e5   : > { %v892_v50 = vadd.f32 %v1531_v10, %v891_v49 }
 0x1e6   : > { %980 = vst.msk [vmem:[%s1538_s19 + $0x98] sm:$0xff] %vm960_vm3, %v897_v48 }
 0x1e7   : > { %979 = vst.msk [vmem:[%s1538_s19 + $0x90] sm:$0xff] %vm960_vm3, %v892_v50  ;;  %v1289_v51 = vpop.f32.mrb[20].mxu1 }
 0x1e8   : > { %v907_v52 = vadd.f32 %v1289_v51, %v1531_v10  ;;  %v901_v53 = vpop.f32.mrb[21].mxu1 }
 0x1e9   : > { %v902_v54 = vadd.f32 %v1531_v10, %v901_v53 }
 0x1ea   : > { %982 = vst.msk [vmem:[%s1538_s19 + $0xa8] sm:$0xff] %vm960_vm3, %v907_v52 }
 0x1eb   : > { %981 = vst.msk [vmem:[%s1538_s19 + $0xa0] sm:$0xff] %vm960_vm3, %v902_v54  ;;  %v1292_v55 = vpop.f32.mrb[22].mxu1 }
 0x1ec   : > { %v917_v56 = vadd.f32 %v1292_v55, %v1531_v10  ;;  %v911_v57 = vpop.f32.mrb[23].mxu1 }
 0x1ed   : > { %v912_v58 = vadd.f32 %v1531_v10, %v911_v57 }
 0x1ee   : > { %984 = vst.msk [vmem:[%s1538_s19 + $0xb8] sm:$0xff] %vm960_vm3, %v917_v56 }
 0x1ef   : > { %983 = vst.msk [vmem:[%s1538_s19 + $0xb0] sm:$0xff] %vm960_vm3, %v912_v58  ;;  %v1295_v59 = vpop.f32.mrb[24].mxu1 }
 0x1f0   : > { %v927_v60 = vadd.f32 %v1295_v59, %v1531_v10  ;;  %v921_v61 = vpop.f32.mrb[25].mxu1 }
 0x1f1   : > { %v922_v62 = vadd.f32 %v1531_v10, %v921_v61 }
 0x1f2   : > { %986 = vst.msk [vmem:[%s1538_s19 + $0xc8] sm:$0xff] %vm960_vm3, %v927_v60 }
 0x1f3   : > { %985 = vst.msk [vmem:[%s1538_s19 + $0xc0] sm:$0xff] %vm960_vm3, %v922_v62  ;;  %v1298_v63 = vpop.f32.mrb[26].mxu1 }
 0x1f4   : > { %v937_v0 = vadd.f32 %v1298_v63, %v1531_v10  ;;  %v931_v1 = vpop.f32.mrb[27].mxu1 }
 0x1f5   : > { %v932_v2 = vadd.f32 %v1531_v10, %v931_v1 }
 0x1f6   : > { %988 = vst.msk [vmem:[%s1538_s19 + $0xd8] sm:$0xff] %vm960_vm3, %v937_v0 }
 0x1f7   : > { %987 = vst.msk [vmem:[%s1538_s19 + $0xd0] sm:$0xff] %vm960_vm3, %v932_v2  ;;  %v1301_v3 = vpop.f32.mrb[28].mxu1 }
 0x1f8   : > { %v947_v4 = vadd.f32 %v1301_v3, %v1531_v10  ;;  %v941_v5 = vpop.f32.mrb[29].mxu1 }
 0x1f9   : > { %v942_v6 = vadd.f32 %v1531_v10, %v941_v5 }
 0x1fa   : > { %990 = vst.msk [vmem:[%s1538_s19 + $0xe8] sm:$0xff] %vm960_vm3, %v947_v4 }
 0x1fb   : > { %989 = vst.msk [vmem:[%s1538_s19 + $0xe0] sm:$0xff] %vm960_vm3, %v942_v6  ;;  %v1304_v7 = vpop.f32.mrb[30].mxu1 }
 0x1fc   : > { %v957_v8 = vadd.f32 %v1304_v7, %v1531_v10  ;;  %v951_v9 = vpop.f32.mrb[31].mxu1 }
 0x1fd   : > { %v952_v40 = vadd.f32 %v1531_v10, %v951_v9 }
 0x1fe   : > { %992 = vst.msk [vmem:[%s1538_s19 + $0xf8] sm:$0xff] %vm960_vm3, %v957_v8 }
 0x1ff   : > { %991 = vst.msk [vmem:[%s1538_s19 + $0xf0] sm:$0xff] %vm960_vm3, %v952_v40 }
 0x200 PF: > { %s15_s18 = sadd.s32 1, %s1327_s18  }
 0x201   : > { %p12_p4 = scmp.ge.s32.totalorder %s15_s18, 4  }
 0x203   :  { %14 = sbr.rel (!%p12_p4) target bundleno = 1 (0x1), region = 70 }

</bundles_post_ra>
